<compile_context>
chip_gen: v7x
topology: tpu7x:2x2x1
jax: 0.10.0
libtpu: 0.0.40
codegen_flags: <defaults>
</compile_context>

<pallas_src>
import math

import jax
import jax.numpy as jnp
from jax.experimental import pallas as pl
from jax.experimental.pallas import tpu as pltpu


# ---------------------------------------------------------------------------
# tiling helpers
# ---------------------------------------------------------------------------
def _round_up(x, m):
    return ((x + m - 1) // m) * m


def _edge_tiles(E):
    """Returns (E_pad, TE). TE is a multiple of 8 (sublane rule)."""
    if E <= 1024:
        e_pad = _round_up(max(E, 8), 8)
        return e_pad, e_pad
    te = 512
    return _round_up(E, te), te


def _node_tiles(N):
    """Returns (N_pad, TM, TK). TK is either the full (padded) dim or a
    multiple of 128 so the A-block last dim obeys the (8,128) rule."""
    if N <= 512:
        n_pad = _round_up(max(N, 8), 8)
        return n_pad, n_pad, n_pad
    tm, tk = 256, 512
    return _round_up(N, tk), tm, tk


# ---------------------------------------------------------------------------
# Pallas kernels
# ---------------------------------------------------------------------------
def _edge_kernel(inp_ref, wmsg_ref, bmsg_ref, ww_ref, bw_ref, wres_ref, bres_ref,
                 eout_ref, ew_ref):
    # inp = [diff, edge_attr, edge_f]  (concatenated in the wrapper)
    inp = inp_ref[...]
    # fused lin_for_node+lin_ec, then relu
    feat = jnp.maximum(
        jnp.dot(inp, wmsg_ref[...], preferred_element_type=jnp.float32)
        + bmsg_ref[...], 0.0)
    # edge_weight = relu(linw(feat))  -> [TE, 1]
    ew = jnp.dot(feat, ww_ref[...], preferred_element_type=jnp.float32) + bw_ref[...]
    ew_ref[...] = jnp.maximum(ew, 0.0)
    # edge residual: feat + lin4_edge(edge_attr); W4e is zero-padded so the same
    # concatenated input can be used (padded K rows are free on the MXU).
    eout_ref[...] = feat + (
        jnp.dot(inp, wres_ref[...], preferred_element_type=jnp.float32)
        + bres_ref[...])


def _node_kernel(a_ref, xk_ref, disk_ref, xm_ref, dism_ref,
                 wg_ref, bg_ref, w4n_ref, b4n_ref, out_ref, acc_ref):
    k = pl.program_id(1)

    @pl.when(k == 0)
    def _():
        acc_ref[...] = jnp.zeros_like(acc_ref)

    # An @ (x @ Wg^T) without materializing An:
    #   acc_m = sum_k  A[m,k] @ ( dis_k * (x_k @ Wg^T) )
    xw = jnp.dot(xk_ref[...], wg_ref[...], preferred_element_type=jnp.float32)
    acc_ref[...] += jnp.dot(a_ref[...], disk_ref[...] * xw,
                            preferred_element_type=jnp.float32)

    @pl.when(k == pl.num_programs(1) - 1)
    def _():
        x1 = jnp.maximum(dism_ref[...] * acc_ref[...] + bg_ref[...], 0.0)
        xres = jnp.dot(xm_ref[...], w4n_ref[...],
                       preferred_element_type=jnp.float32) + b4n_ref[...]
        out_ref[...] = x1 + xres


# ---------------------------------------------------------------------------
# Wrapper (glue: gathers, scatter to dense adjacency, weight fusion/splits)
# ---------------------------------------------------------------------------
def res_egblk_forward(x, edge_index, edge_f, edge_attr, params):
    N, node_in = x.shape
    E = edge_index.shape[1]
    edge_in = edge_attr.shape[1]
    Ef = edge_f.shape[1]

    Wn, bn = params["lin_for_node"]
    Wec, bec = params["lin_ec"]
    Ww, bw = params["linw"]
    W4e, b4e = params["lin4_edge"]
    Wg, bg = params["gcn"]
    W4n, b4n = params["lin4_node"]

    edge_out = Wec.shape[0]
    node_out = Wg.shape[0]
    fin = node_in + edge_in + Ef

    row, col = edge_index[0], edge_index[1]            # row = source j, col = target i
    diff = x[row] - x[col]                             # x_j - x_i  (gather glue)
    inp = jnp.concatenate([diff, edge_attr, edge_f], axis=-1)   # [E, fin]

    # --- fuse lin_for_node into lin_ec's node slice (no nonlinearity between) ---
    WecT = Wec.T                                       # [fin, edge_out]
    wec_n = WecT[:node_in]
    w_node_fused = Wn.T @ wec_n                        # [node_in, edge_out]
    b_fused = bec + bn @ wec_n                         # [edge_out]
    Wmsg = jnp.concatenate([w_node_fused, WecT[node_in:]], axis=0)   # [fin, edge_out]
    # residual lin4_edge expressed on the same concatenated input (zero-padded K)
    Wres = jnp.concatenate(
        [jnp.zeros((node_in, edge_out), jnp.float32),
         W4e.T,
         jnp.zeros((Ef, edge_out), jnp.float32)], axis=0)          # [fin, edge_out]

    # --- edge kernel: tiled over E, weights resident ---
    E_pad, TE = _edge_tiles(E)
    if E_pad != E:
        inp = jnp.pad(inp, ((0, E_pad - E), (0, 0)))

    edge_cost = pl.CostEstimate(
        flops=int(2 * E_pad * fin * edge_out * 2 + 2 * E_pad * edge_out),
        transcendentals=0,
        bytes_accessed=int(4 * (E_pad * fin + 2 * fin * edge_out
                                + E_pad * (edge_out + 1))),
    )
    edge_sum_p, edge_weight_p = pl.pallas_call(
        _edge_kernel,
        grid=(E_pad // TE,),
        in_specs=[
            pl.BlockSpec((TE, fin), lambda e: (e, 0)),          # concatenated edge input
            pl.BlockSpec((fin, edge_out), lambda e: (0, 0)),    # fused msg weight
            pl.BlockSpec((1, edge_out), lambda e: (0, 0)),      # fused msg bias
            pl.BlockSpec((edge_out, 1), lambda e: (0, 0)),      # linw weight
            pl.BlockSpec((1, 1), lambda e: (0, 0)),             # linw bias
            pl.BlockSpec((fin, edge_out), lambda e: (0, 0)),    # padded lin4_edge weight
            pl.BlockSpec((1, edge_out), lambda e: (0, 0)),      # lin4_edge bias
        ],
        out_specs=(pl.BlockSpec((TE, edge_out), lambda e: (e, 0)),
                   pl.BlockSpec((TE, 1), lambda e: (e, 0))),
        out_shape=(jax.ShapeDtypeStruct((E_pad, edge_out), jnp.float32),
                   jax.ShapeDtypeStruct((E_pad, 1), jnp.float32)),
        compiler_params=pltpu.CompilerParams(dimension_semantics=("parallel",)),
        cost_estimate=edge_cost,
    )(inp, Wmsg, b_fused[None, :], Ww.T, bw[None, :], Wres, b4e[None, :])

    edge_sum = edge_sum_p[:E]
    w = edge_weight_p[:E, 0]

    # --- add_remaining_self_loops + dense weighted adjacency (scatter glue) ---
    # TODO(synk): replace the dense [N,N] build + XLA scatter with a sorted-CSR
    # segment-sum SpMM inside the node kernel (PrefetchScalarGridSpec) for large N.
    self_mask = row == col
    w_off = jnp.where(self_mask, 0.0, w)
    A = jnp.zeros((N, N), jnp.float32).at[col, row].add(w_off)
    # PyG add_remaining_self_loops: existing self-loop keeps its weight, else 1.0
    self_idx = jnp.where(self_mask, col, N)            # OOB index -> dropped
    diag = jnp.ones((N,), jnp.float32).at[self_idx].set(w, mode="drop")
    A = A + jnp.diag(diag)
    # deg from an O(E) segment sum (no extra O(N^2) pass over A)
    deg = jnp.zeros((N,), jnp.float32).at[col].add(w_off) + diag
    dis = jnp.where(deg > 0.0, jax.lax.rsqrt(deg), 0.0)[:, None]   # [N, 1]

    # --- node kernel: tiled (row, k) GCN + residual ---
    N_pad, TM, TK = _node_tiles(N)
    if N_pad != N:
        x_p = jnp.pad(x, ((0, N_pad - N), (0, 0)))
        A_p = jnp.pad(A, ((0, N_pad - N), (0, N_pad - N)))
        dis_p = jnp.pad(dis, ((0, N_pad - N), (0, 0)))
    else:
        x_p, A_p, dis_p = x, A, dis

    node_cost = pl.CostEstimate(
        flops=int(2 * N_pad * N_pad * node_out
                  + 2 * N_pad * node_in * node_out * (N_pad // TM + 1)),
        transcendentals=0,
        bytes_accessed=int(4 * (N_pad * N_pad + 2 * N_pad * node_in + 2 * N_pad
                                + 2 * node_in * node_out + N_pad * node_out)),
    )
    x_out_p = pl.pallas_call(
        _node_kernel,
        grid=(N_pad // TM, N_pad // TK),
        in_specs=[
            pl.BlockSpec((TM, TK), lambda m, k: (m, k)),          # A tile
            pl.BlockSpec((TK, node_in), lambda m, k: (k, 0)),     # x (k tile, for xw)
            pl.BlockSpec((TK, 1), lambda m, k: (k, 0)),           # dis (k tile)
            pl.BlockSpec((TM, node_in), lambda m, k: (m, 0)),     # x (m tile, residual)
            pl.BlockSpec((TM, 1), lambda m, k: (m, 0)),           # dis (m tile)
            pl.BlockSpec((node_in, node_out), lambda m, k: (0, 0)),   # Wg^T
            pl.BlockSpec((1, node_out), lambda m, k: (0, 0)),         # bg
            pl.BlockSpec((node_in, node_out), lambda m, k: (0, 0)),   # W4n^T
            pl.BlockSpec((1, node_out), lambda m, k: (0, 0)),         # b4n
        ],
        out_specs=pl.BlockSpec((TM, node_out), lambda m, k: (m, 0)),
        out_shape=jax.ShapeDtypeStruct((N_pad, node_out), jnp.float32),
        scratch_shapes=[pltpu.VMEM((TM, node_out), jnp.float32)],
        compiler_params=pltpu.CompilerParams(
            dimension_semantics=("parallel", "arbitrary")),
        cost_estimate=node_cost,
    )(A_p, x_p, dis_p, x_p, dis_p,
      Wg.T, bg[None, :], W4n.T, b4n[None, :])

    x_out = x_out_p[:N]

    # mirrors: return (x_1 + x, edge_index, edge_f, edge_features + edge_attr, device)
    return x_out, edge_index, edge_f, edge_sum


# ---------------------------------------------------------------------------
# Pure-JAX reference (mirrors the PyTorch module) for a correctness check
# ---------------------------------------------------------------------------
def reference_forward(x, edge_index, edge_f, edge_attr, params):
    hp = jax.lax.Precision.HIGHEST
    Wn, bn = params["lin_for_node"]
    Wec, bec = params["lin_ec"]
    Ww, bw = params["linw"]
    W4e, b4e = params["lin4_edge"]
    Wg, bg = params["gcn"]
    W4n, b4n = params["lin4_node"]

    row, col = edge_index[0], edge_index[1]
    diff = x[row] - x[col]
    h = jnp.dot(diff, Wn.T, precision=hp) + bn
    msg = jnp.dot(jnp.concatenate([h, edge_attr, edge_f], axis=-1), Wec.T,
                  precision=hp) + bec
    feat = jnp.maximum(msg, 0.0)
    ew = jnp.maximum(jnp.dot(feat, Ww.T, precision=hp) + bw, 0.0)

    N = x.shape[0]
    w = ew[:, 0]
    self_mask = row == col
    w_off = jnp.where(self_mask, 0.0, w)
    A = jnp.zeros((N, N), jnp.float32).at[col, row].add(w_off)
    self_idx = jnp.where(self_mask, col, N)
    diag = jnp.ones((N,), jnp.float32).at[self_idx].set(w, mode="drop")
    A = A + jnp.diag(diag)
    deg = A.sum(axis=1)
    dis = jnp.where(deg > 0, 1.0 / jnp.sqrt(deg), 0.0)
    An = dis[:, None] * A * dis[None, :]
    x1 = jnp.maximum(jnp.dot(An, jnp.dot(x, Wg.T, precision=hp), precision=hp) + bg, 0.0)
    xres = jnp.dot(x, W4n.T, precision=hp) + b4n
    eout = feat + jnp.dot(edge_attr, W4e.T, precision=hp) + b4e
    return x1 + xres, eout


# ---------------------------------------------------------------------------
def _linear_params(key, in_f, out_f):
    k1, k2 = jax.random.split(key)
    bound = 1.0 / math.sqrt(in_f)
    W = jax.random.uniform(k1, (out_f, in_f), jnp.float32, -bound, bound)
    b = jax.random.uniform(k2, (out_f,), jnp.float32, -bound, bound)
    return W, b


if __name__ == "__main__":
    N, E = 16, 24
    node_in, node_out = 8, 16
    edge_in, edge_out, Ef = 8, 16, 4

    key = jax.random.PRNGKey(0)
    ks = jax.random.split(key, 12)

    x = jax.random.normal(ks[0], (N, node_in), jnp.float32)
    row = jax.random.randint(ks[1], (E,), 0, N)
    off = jax.random.randint(ks[2], (E,), 1, N)
    col = (row + off) % N                              # no self-loops
    edge_index = jnp.stack([row, col])
    edge_attr = jax.random.normal(ks[3], (E, edge_in), jnp.float32)
    edge_f = jax.random.normal(ks[4], (E, Ef), jnp.float32)

    params = {
        "lin_for_node": _linear_params(ks[5], node_in, node_in),
        "lin_ec":       _linear_params(ks[6], node_in + edge_in + Ef, edge_out),
        "linw":         _linear_params(ks[7], edge_out, 1),
        "lin4_edge":    _linear_params(ks[8], edge_in, edge_out),
        "gcn":          _linear_params(ks[9], node_in, node_out),   # (W [out,in], bias)
        "lin4_node":    _linear_params(ks[10], node_in, node_out),
    }

    fwd = jax.jit(res_egblk_forward)
    x_out, ei_out, ef_out, edge_out_feats = fwd(x, edge_index, edge_f, edge_attr, params)
    jax.block_until_ready((x_out, edge_out_feats))

    x_ref, e_ref = reference_forward(x, edge_index, edge_f, edge_attr, params)
    assert jnp.allclose(x_out, x_ref, rtol=5e-3, atol=5e-3), "node output mismatch"
    assert jnp.allclose(edge_out_feats, e_ref, rtol=5e-3, atol=5e-3), "edge output mismatch"

    print("KERNEL_OK")
</pallas_src>

<mosaic_0001>
module attributes {stable_mosaic.version = 11 : i64} {
  func.func @_edge_kernel(%arg0: i32, %arg1: memref<24x20xf32, #tpu.memory_space<vmem>>, %arg2: memref<20x16xf32, #tpu.memory_space<vmem>>, %arg3: memref<1x16xf32, #tpu.memory_space<vmem>>, %arg4: memref<16x1xf32, #tpu.memory_space<vmem>>, %arg5: memref<1x1xf32, #tpu.memory_space<vmem>>, %arg6: memref<20x16xf32, #tpu.memory_space<vmem>>, %arg7: memref<1x16xf32, #tpu.memory_space<vmem>>, %arg8: memref<24x16xf32, #tpu.memory_space<vmem>>, %arg9: memref<24x1xf32, #tpu.memory_space<vmem>>) attributes {dimension_semantics = [#tpu.dimension_semantics<parallel>], iteration_bounds = array<i64: 1>, scalar_prefetch = 0 : i64, scratch_operands = 0 : i64, tpu.core_type = #tpu.core_type<tc>, window_params = [{transform_indices = @transform_0, window_bounds = array<i64: 24, 20>}, {pipeline_mode = #tpu.pipeline_mode<synchronous>, transform_indices = @transform_1, window_bounds = array<i64: 20, 16>}, {pipeline_mode = #tpu.pipeline_mode<synchronous>, transform_indices = @transform_2, window_bounds = array<i64: 1, 16>}, {pipeline_mode = #tpu.pipeline_mode<synchronous>, transform_indices = @transform_3, window_bounds = array<i64: 16, 1>}, {pipeline_mode = #tpu.pipeline_mode<synchronous>, transform_indices = @transform_4, window_bounds = array<i64: 1, 1>}, {pipeline_mode = #tpu.pipeline_mode<synchronous>, transform_indices = @transform_5, window_bounds = array<i64: 20, 16>}, {pipeline_mode = #tpu.pipeline_mode<synchronous>, transform_indices = @transform_6, window_bounds = array<i64: 1, 16>}, {transform_indices = @transform_7, window_bounds = array<i64: 24, 16>}, {transform_indices = @transform_8, window_bounds = array<i64: 24, 1>}]} {
    %c0 = arith.constant 0 : index
    %c0_0 = arith.constant 0 : index
    %0 = vector.load %arg1[%c0, %c0_0] : memref<24x20xf32, #tpu.memory_space<vmem>>, vector<24x20xf32>
    %c0_1 = arith.constant 0 : index
    %c0_2 = arith.constant 0 : index
    %1 = vector.load %arg2[%c0_1, %c0_2] : memref<20x16xf32, #tpu.memory_space<vmem>>, vector<20x16xf32>
    %cst = arith.constant dense<0.000000e+00> : vector<24x16xf32>
    %2 = tpu.matmul %0, %1, %cst {dimension_numbers = #tpu.dot_dimension_numbers<[1], [0], [0], [1], [0, 0, 1, 1], [], []>} : vector<24x20xf32>, vector<20x16xf32>, vector<24x16xf32> -> vector<24x16xf32>
    %c0_3 = arith.constant 0 : index
    %c0_4 = arith.constant 0 : index
    %3 = vector.load %arg3[%c0_3, %c0_4] : memref<1x16xf32, #tpu.memory_space<vmem>>, vector<1x16xf32>
    %4 = vector.broadcast %3 : vector<1x16xf32> to vector<24x16xf32>
    %5 = arith.addf %2, %4 : vector<24x16xf32>
    %cst_5 = arith.constant 0.000000e+00 : f32
    %6 = vector.broadcast %cst_5 : f32 to vector<24x16xf32>
    %7 = arith.maximumf %5, %6 : vector<24x16xf32>
    %c0_6 = arith.constant 0 : index
    %c0_7 = arith.constant 0 : index
    %8 = vector.load %arg4[%c0_6, %c0_7] : memref<16x1xf32, #tpu.memory_space<vmem>>, vector<16x1xf32>
    %cst_8 = arith.constant dense<0.000000e+00> : vector<24x1xf32>
    %9 = tpu.matmul %7, %8, %cst_8 {dimension_numbers = #tpu.dot_dimension_numbers<[1], [0], [0], [1], [0, 0, 1, 1], [], []>} : vector<24x16xf32>, vector<16x1xf32>, vector<24x1xf32> -> vector<24x1xf32>
    %c0_9 = arith.constant 0 : index
    %c0_10 = arith.constant 0 : index
    %10 = vector.load %arg5[%c0_9, %c0_10] : memref<1x1xf32, #tpu.memory_space<vmem>>, vector<1x1xf32>
    %11 = vector.broadcast %10 : vector<1x1xf32> to vector<24x1xf32>
    %12 = arith.addf %9, %11 : vector<24x1xf32>
    %cst_11 = arith.constant 0.000000e+00 : f32
    %13 = vector.broadcast %cst_11 : f32 to vector<24x1xf32>
    %14 = arith.maximumf %12, %13 : vector<24x1xf32>
    %c0_12 = arith.constant 0 : index
    %c0_13 = arith.constant 0 : index
    %15 = vector.load %arg9[%c0_12, %c0_13] : memref<24x1xf32, #tpu.memory_space<vmem>>, vector<24x1xf32>
    tpu.vector_store %arg9[%c0_12, %c0_13], %14 {strides = array<i32>} : memref<24x1xf32, #tpu.memory_space<vmem>>, vector<24x1xf32>,
    %c0_14 = arith.constant 0 : index
    %c0_15 = arith.constant 0 : index
    %16 = vector.load %arg6[%c0_14, %c0_15] : memref<20x16xf32, #tpu.memory_space<vmem>>, vector<20x16xf32>
    %cst_16 = arith.constant dense<0.000000e+00> : vector<24x16xf32>
    %17 = tpu.matmul %0, %16, %cst_16 {dimension_numbers = #tpu.dot_dimension_numbers<[1], [0], [0], [1], [0, 0, 1, 1], [], []>} : vector<24x20xf32>, vector<20x16xf32>, vector<24x16xf32> -> vector<24x16xf32>
    %c0_17 = arith.constant 0 : index
    %c0_18 = arith.constant 0 : index
    %18 = vector.load %arg7[%c0_17, %c0_18] : memref<1x16xf32, #tpu.memory_space<vmem>>, vector<1x16xf32>
    %19 = vector.broadcast %18 : vector<1x16xf32> to vector<24x16xf32>
    %20 = arith.addf %17, %19 : vector<24x16xf32>
    %21 = arith.addf %7, %20 : vector<24x16xf32>
    %c0_19 = arith.constant 0 : index
    %c0_20 = arith.constant 0 : index
    %22 = vector.load %arg8[%c0_19, %c0_20] : memref<24x16xf32, #tpu.memory_space<vmem>>, vector<24x16xf32>
    tpu.vector_store %arg8[%c0_19, %c0_20], %21 {strides = array<i32>} : memref<24x16xf32, #tpu.memory_space<vmem>>, vector<24x16xf32>,
    return
  }
  func.func @transform_0(%arg0: i32) -> (i32, i32) {
    %c0_i32 = arith.constant 0 : i32
    %c0_i32_0 = arith.constant 0 : i32
    return %arg0, %c0_i32 : i32, i32
  }
  func.func @transform_1(%arg0: i32) -> (i32, i32) {
    %c0_i32 = arith.constant 0 : i32
    %c0_i32_0 = arith.constant 0 : i32
    %c0_i32_1 = arith.constant 0 : i32
    return %c0_i32, %c0_i32_0 : i32, i32
  }
  func.func @transform_2(%arg0: i32) -> (i32, i32) {
    %c0_i32 = arith.constant 0 : i32
    %c0_i32_0 = arith.constant 0 : i32
    %c0_i32_1 = arith.constant 0 : i32
    return %c0_i32, %c0_i32_0 : i32, i32
  }
  func.func @transform_3(%arg0: i32) -> (i32, i32) {
    %c0_i32 = arith.constant 0 : i32
    %c0_i32_0 = arith.constant 0 : i32
    %c0_i32_1 = arith.constant 0 : i32
    return %c0_i32, %c0_i32_0 : i32, i32
  }
  func.func @transform_4(%arg0: i32) -> (i32, i32) {
    %c0_i32 = arith.constant 0 : i32
    %c0_i32_0 = arith.constant 0 : i32
    %c0_i32_1 = arith.constant 0 : i32
    return %c0_i32, %c0_i32_0 : i32, i32
  }
  func.func @transform_5(%arg0: i32) -> (i32, i32) {
    %c0_i32 = arith.constant 0 : i32
    %c0_i32_0 = arith.constant 0 : i32
    %c0_i32_1 = arith.constant 0 : i32
    return %c0_i32, %c0_i32_0 : i32, i32
  }
  func.func @transform_6(%arg0: i32) -> (i32, i32) {
    %c0_i32 = arith.constant 0 : i32
    %c0_i32_0 = arith.constant 0 : i32
    %c0_i32_1 = arith.constant 0 : i32
    return %c0_i32, %c0_i32_0 : i32, i32
  }
  func.func @transform_7(%arg0: i32) -> (i32, i32) {
    %c0_i32 = arith.constant 0 : i32
    %c0_i32_0 = arith.constant 0 : i32
    return %arg0, %c0_i32 : i32, i32
  }
  func.func @transform_8(%arg0: i32) -> (i32, i32) {
    %c0_i32 = arith.constant 0 : i32
    %c0_i32_0 = arith.constant 0 : i32
    return %arg0, %c0_i32 : i32, i32
  }
}

module attributes {stable_mosaic.version = 11 : i64} {
  func.func @_node_kernel(%arg0: i32, %arg1: i32, %arg2: memref<16x16xf32, #tpu.memory_space<vmem>>, %arg3: memref<16x8xf32, #tpu.memory_space<vmem>>, %arg4: memref<16x1xf32, #tpu.memory_space<vmem>>, %arg5: memref<16x8xf32, #tpu.memory_space<vmem>>, %arg6: memref<16x1xf32, #tpu.memory_space<vmem>>, %arg7: memref<8x16xf32, #tpu.memory_space<vmem>>, %arg8: memref<1x16xf32, #tpu.memory_space<vmem>>, %arg9: memref<8x16xf32, #tpu.memory_space<vmem>>, %arg10: memref<1x16xf32, #tpu.memory_space<vmem>>, %arg11: memref<16x16xf32, #tpu.memory_space<vmem>>, %arg12: memref<16x16xf32, #tpu.memory_space<vmem>>) attributes {dimension_semantics = [#tpu.dimension_semantics<parallel>, #tpu.dimension_semantics<arbitrary>], iteration_bounds = array<i64: 1, 1>, scalar_prefetch = 0 : i64, scratch_operands = 1 : i64, tpu.core_type = #tpu.core_type<tc>, window_params = [{transform_indices = @transform_0, window_bounds = array<i64: 16, 16>}, {transform_indices = @transform_1, window_bounds = array<i64: 16, 8>}, {transform_indices = @transform_2, window_bounds = array<i64: 16, 1>}, {transform_indices = @transform_3, window_bounds = array<i64: 16, 8>}, {transform_indices = @transform_4, window_bounds = array<i64: 16, 1>}, {pipeline_mode = #tpu.pipeline_mode<synchronous>, transform_indices = @transform_5, window_bounds = array<i64: 8, 16>}, {pipeline_mode = #tpu.pipeline_mode<synchronous>, transform_indices = @transform_6, window_bounds = array<i64: 1, 16>}, {pipeline_mode = #tpu.pipeline_mode<synchronous>, transform_indices = @transform_7, window_bounds = array<i64: 8, 16>}, {pipeline_mode = #tpu.pipeline_mode<synchronous>, transform_indices = @transform_8, window_bounds = array<i64: 1, 16>}, {transform_indices = @transform_9, window_bounds = array<i64: 16, 16>}]} {
    %c0_i32 = arith.constant 0 : i32
    %0 = arith.cmpi eq, %arg1, %c0_i32 : i32
    %1 = arith.extui %0 : i1 to i32
    %c0_i32_0 = arith.constant 0 : i32
    %2 = arith.cmpi ne, %1, %c0_i32_0 : i32
    scf.if %2 {
      %cst_15 = arith.constant 0.000000e+00 : f32
      %17 = vector.broadcast %cst_15 : f32 to vector<16x16xf32>
      %c0_16 = arith.constant 0 : index
      %c0_17 = arith.constant 0 : index
      %18 = vector.load %arg12[%c0_16, %c0_17] : memref<16x16xf32, #tpu.memory_space<vmem>>, vector<16x16xf32>
      tpu.vector_store %arg12[%c0_16, %c0_17], %17 {strides = array<i32>} : memref<16x16xf32, #tpu.memory_space<vmem>>, vector<16x16xf32>,
    } else {
    }
    %c0 = arith.constant 0 : index
    %c0_1 = arith.constant 0 : index
    %3 = vector.load %arg3[%c0, %c0_1] : memref<16x8xf32, #tpu.memory_space<vmem>>, vector<16x8xf32>
    %c0_2 = arith.constant 0 : index
    %c0_3 = arith.constant 0 : index
    %4 = vector.load %arg7[%c0_2, %c0_3] : memref<8x16xf32, #tpu.memory_space<vmem>>, vector<8x16xf32>
    %cst = arith.constant dense<0.000000e+00> : vector<16x16xf32>
    %5 = tpu.matmul %3, %4, %cst {dimension_numbers = #tpu.dot_dimension_numbers<[1], [0], [0], [1], [0, 0, 1, 1], [], []>} : vector<16x8xf32>, vector<8x16xf32>, vector<16x16xf32> -> vector<16x16xf32>
    %c0_4 = arith.constant 0 : index
    %c0_5 = arith.constant 0 : index
    %6 = vector.load %arg12[%c0_4, %c0_5] : memref<16x16xf32, #tpu.memory_space<vmem>>, vector<16x16xf32>
    %c0_6 = arith.constant 0 : index
    %c0_7 = arith.constant 0 : index
    %7 = vector.load %arg2[%c0_6, %c0_7] : memref<16x16xf32, #tpu.memory_space<vmem>>, vector<16x16xf32>
    %c0_8 = arith.constant 0 : index
    %c0_9 = arith.constant 0 : index
    %8 = vector.load %arg4[%c0_8, %c0_9] : memref<16x1xf32, #tpu.memory_space<vmem>>, vector<16x1xf32>
    %9 = vector.broadcast %8 : vector<16x1xf32> to vector<16x16xf32>
    %10 = arith.mulf %9, %5 : vector<16x16xf32>
    %cst_10 = arith.constant dense<0.000000e+00> : vector<16x16xf32>
    %11 = tpu.matmul %7, %10, %cst_10 {dimension_numbers = #tpu.dot_dimension_numbers<[1], [0], [0], [1], [0, 0, 1, 1], [], []>} : vector<16x16xf32>, vector<16x16xf32>, vector<16x16xf32> -> vector<16x16xf32>
    %12 = arith.addf %6, %11 : vector<16x16xf32>
    %c0_11 = arith.constant 0 : index
    %c0_12 = arith.constant 0 : index
    %13 = vector.load %arg12[%c0_11, %c0_12] : memref<16x16xf32, #tpu.memory_space<vmem>>, vector<16x16xf32>
    tpu.vector_store %arg12[%c0_11, %c0_12], %12 {strides = array<i32>} : memref<16x16xf32, #tpu.memory_space<vmem>>, vector<16x16xf32>,
    %c0_i32_13 = arith.constant 0 : i32
    %14 = arith.cmpi eq, %arg1, %c0_i32_13 : i32
    %15 = arith.extui %14 : i1 to i32
    %c0_i32_14 = arith.constant 0 : i32
    %16 = arith.cmpi ne, %15, %c0_i32_14 : i32
    scf.if %16 {
      %c0_15 = arith.constant 0 : index
      %c0_16 = arith.constant 0 : index
      %17 = vector.load %arg6[%c0_15, %c0_16] : memref<16x1xf32, #tpu.memory_space<vmem>>, vector<16x1xf32>
      %c0_17 = arith.constant 0 : index
      %c0_18 = arith.constant 0 : index
      %18 = vector.load %arg12[%c0_17, %c0_18] : memref<16x16xf32, #tpu.memory_space<vmem>>, vector<16x16xf32>
      %19 = vector.broadcast %17 : vector<16x1xf32> to vector<16x16xf32>
      %20 = arith.mulf %19, %18 : vector<16x16xf32>
      %c0_19 = arith.constant 0 : index
      %c0_20 = arith.constant 0 : index
      %21 = vector.load %arg8[%c0_19, %c0_20] : memref<1x16xf32, #tpu.memory_space<vmem>>, vector<1x16xf32>
      %22 = vector.broadcast %21 : vector<1x16xf32> to vector<16x16xf32>
      %23 = arith.addf %20, %22 : vector<16x16xf32>
      %cst_21 = arith.constant 0.000000e+00 : f32
      %24 = vector.broadcast %cst_21 : f32 to vector<16x16xf32>
      %25 = arith.maximumf %23, %24 : vector<16x16xf32>
      %c0_22 = arith.constant 0 : index
      %c0_23 = arith.constant 0 : index
      %26 = vector.load %arg5[%c0_22, %c0_23] : memref<16x8xf32, #tpu.memory_space<vmem>>, vector<16x8xf32>
      %c0_24 = arith.constant 0 : index
      %c0_25 = arith.constant 0 : index
      %27 = vector.load %arg9[%c0_24, %c0_25] : memref<8x16xf32, #tpu.memory_space<vmem>>, vector<8x16xf32>
      %cst_26 = arith.constant dense<0.000000e+00> : vector<16x16xf32>
      %28 = tpu.matmul %26, %27, %cst_26 {dimension_numbers = #tpu.dot_dimension_numbers<[1], [0], [0], [1], [0, 0, 1, 1], [], []>} : vector<16x8xf32>, vector<8x16xf32>, vector<16x16xf32> -> vector<16x16xf32>
      %c0_27 = arith.constant 0 : index
      %c0_28 = arith.constant 0 : index
      %29 = vector.load %arg10[%c0_27, %c0_28] : memref<1x16xf32, #tpu.memory_space<vmem>>, vector<1x16xf32>
      %30 = vector.broadcast %29 : vector<1x16xf32> to vector<16x16xf32>
      %31 = arith.addf %28, %30 : vector<16x16xf32>
      %32 = arith.addf %25, %31 : vector<16x16xf32>
      %c0_29 = arith.constant 0 : index
      %c0_30 = arith.constant 0 : index
      %33 = vector.load %arg11[%c0_29, %c0_30] : memref<16x16xf32, #tpu.memory_space<vmem>>, vector<16x16xf32>
      tpu.vector_store %arg11[%c0_29, %c0_30], %32 {strides = array<i32>} : memref<16x16xf32, #tpu.memory_space<vmem>>, vector<16x16xf32>,
    } else {
    }
    return
  }
  func.func @transform_0(%arg0: i32, %arg1: i32) -> (i32, i32) {
    %c0_i32 = arith.constant 0 : i32
    return %arg0, %arg1 : i32, i32
  }
  func.func @transform_1(%arg0: i32, %arg1: i32) -> (i32, i32) {
    %c0_i32 = arith.constant 0 : i32
    %c0_i32_0 = arith.constant 0 : i32
    return %arg1, %c0_i32 : i32, i32
  }
  func.func @transform_2(%arg0: i32, %arg1: i32) -> (i32, i32) {
    %c0_i32 = arith.constant 0 : i32
    %c0_i32_0 = arith.constant 0 : i32
    return %arg1, %c0_i32 : i32, i32
  }
  func.func @transform_3(%arg0: i32, %arg1: i32) -> (i32, i32) {
    %c0_i32 = arith.constant 0 : i32
    %c0_i32_0 = arith.constant 0 : i32
    return %arg0, %c0_i32 : i32, i32
  }
  func.func @transform_4(%arg0: i32, %arg1: i32) -> (i32, i32) {
    %c0_i32 = arith.constant 0 : i32
    %c0_i32_0 = arith.constant 0 : i32
    return %arg0, %c0_i32 : i32, i32
  }
  func.func @transform_5(%arg0: i32, %arg1: i32) -> (i32, i32) {
    %c0_i32 = arith.constant 0 : i32
    %c0_i32_0 = arith.constant 0 : i32
    %c0_i32_1 = arith.constant 0 : i32
    return %c0_i32, %c0_i32_0 : i32, i32
  }
  func.func @transform_6(%arg0: i32, %arg1: i32) -> (i32, i32) {
    %c0_i32 = arith.constant 0 : i32
    %c0_i32_0 = arith.constant 0 : i32
    %c0_i32_1 = arith.constant 0 : i32
    return %c0_i32, %c0_i32_0 : i32, i32
  }
  func.func @transform_7(%arg0: i32, %arg1: i32) -> (i32, i32) {
    %c0_i32 = arith.constant 0 : i32
    %c0_i32_0 = arith.constant 0 : i32
    %c0_i32_1 = arith.constant 0 : i32
    return %c0_i32, %c0_i32_0 : i32, i32
  }
  func.func @transform_8(%arg0: i32, %arg1: i32) -> (i32, i32) {
    %c0_i32 = arith.constant 0 : i32
    %c0_i32_0 = arith.constant 0 : i32
    %c0_i32_1 = arith.constant 0 : i32
    return %c0_i32, %c0_i32_0 : i32, i32
  }
  func.func @transform_9(%arg0: i32, %arg1: i32) -> (i32, i32) {
    %c0_i32 = arith.constant 0 : i32
    %c0_i32_0 = arith.constant 0 : i32
    return %arg0, %c0_i32 : i32, i32
  }
}

</mosaic_0001>

<bundles_post_ra>
// kernel: sub.1
= control target key start
LH: loop header
LB: loop body
LE: loop exit
PB: predicated region body
PF: predicated region fallthrough
CT: control target
= control target key end

     0   :  { %s78_s0 = inlined_call_operand.vmem [shape: f32[24,8], index: 0, kind: input, shape index: {}]   ;;  %s79_s1 = inlined_call_operand.vmem [shape: f32[24,8], index: 1, kind: input, shape index: {}]   ;;  %s80_s2 = inlined_call_operand.vmem [shape: f32[24,8], index: 2, kind: output, shape index: {}]  }
   0x1   :  { %v3_v0 = vld [vmem:[%s78_s0] sm:$0xff]  ;;  %v30_v2 = vld [vmem:[%s78_s0 + $0x8] sm:$0xff]  ;;  %v33_v5 = vld [vmem:[%s78_s0 + $0x10] sm:$0xff] }
   0x2   :  { %v4_v1 = vld [vmem:[%s79_s1] sm:$0xff]  ;;  %v31_v4 = vld [vmem:[%s79_s1 + $0x8] sm:$0xff]  ;;  %v34_v6 = vld [vmem:[%s79_s1 + $0x10] sm:$0xff] }
   0x3   :  { %v7_v3 = vsub.f32 %v3_v0, %v4_v1  ;;  %v16_v7 = vsub.f32 %v30_v2, %v31_v4  ;;  %v26_v8 = vsub.f32 %v33_v5, %v34_v6 }
   0x5   :  { %9 = vst [vmem:[%s80_s2] sm:$0xff] %v7_v3  ;;  %32 = vst [vmem:[%s80_s2 + $0x8] sm:$0xff] %v16_v7 }
   0x6   :  { %35 = vst [vmem:[%s80_s2 + $0x10] sm:$0xff] %v26_v8 }

// kernel: res_egblk_forward.2
= control target key start
LH: loop header
LB: loop body
LE: loop exit
PB: predicated region body
PF: predicated region fallthrough
CT: control target
= control target key end

     0   :  { %v441_v0 = vmov 0.0|0.0   ;;  %vm442_vm0 = vmmov 0   ;;  %v443_v3 = vmov 0.0   ;;  %vm53_vm1 = vcmask 1043456   ;;  %s583_s1 = inlined_call_operand.vmem [shape: f32[20,16], index: 1, kind: input, shape index: {}]   ;;  %s584_s0 = inlined_call_operand.vmem [shape: f32[24,20], index: 0, kind: input, shape index: {}]   ;;  %s585_s3 = inlined_call_operand.vmem [shape: f32[16,1], index: 3, kind: input, shape index: {}]   ;;  %s586_s4 = inlined_call_operand.<no memory space> [shape: f32[1,1], index: 4, kind: input, shape index: {}]   ;;  %s587_s2 = inlined_call_operand.vmem [shape: f32[1,16], index: 2, kind: input, shape index: {}]   ;;  %s588_s5 = inlined_call_operand.vmem [shape: f32[20,16], index: 5, kind: input, shape index: {}]   ;;  %s589_s8 = inlined_call_operand.vmem [shape: f32[24,1], index: 8, kind: output, shape index: {1}]   ;;  %s590_s6 = inlined_call_operand.vmem [shape: f32[1,16], index: 6, kind: input, shape index: {}]   ;;  %s591_s7 = inlined_call_operand.vmem [shape: f32[24,16], index: 7, kind: output, shape index: {0}]  }
   0x1   :  { %427 = vmatprep.subr.bf16.mxu0 %v441_v0  ;;  %v33_v1 = vld [vmem:[%s583_s1] sm:$0xff]  ;;  %v34_v2 = vld [vmem:[%s583_s1 + $0x8] sm:$0xff]  ;;  %390 = vmatprep.mubr.msk.f32.mxu0 %vm442_vm0, %v443_v3  ;;  %v35_v5 = vld [vmem:[%s583_s1 + $0x10] sm:$0xf]  ;;  %vm43_vm2 = vcmask 162816   ;;  %v14_v12 = vstv %s586_s4  ;;  %vm149_vm3 = vcmask 130048  }
   0x2   :  { %v428_v4 = vpack.c.bf16 %v34_v2, %v33_v1  ;;  %436 = vmatprep.subr.bf16.mxu1 %v441_v0  ;;  %406 = vmatprep.mubr.msk.f32.mxu1 %vm442_vm0, %v443_v3  ;;  %v30_v6 = vld [vmem:[%s584_s0] sm:$0xff]  ;;  %v31_v7 = vld [vmem:[%s584_s0 + $0x8] sm:$0xff]  ;;  %v32_v8 = vld [vmem:[%s584_s0 + $0x10] sm:$0xff]  ;;  %15 = vst [vmem:[#allocation2] sm:$0x1] %v14_v12  ;;  %vm242_vm4 = vcmask 7168  }
   0x3   :  { %v140_v9 = vld [vmem:[%s585_s3] sm:$0xff]  ;;  %v141_v10 = vld [vmem:[%s585_s3 + $0x8] sm:$0xff]  ;;  %v248_v29 = vld [vmem:[%s588_s5 + $0x10] sm:$0xf] }
   0x4   :  { %429 = vmatpush3.bf16.msra.mxu0 %v428_v4  ;;  %v431_v11 = vpack.c.bf16 %v141_v10, %v140_v9  ;;  %v353_v13 = vld [vmem:[%s587_s2] ss:$0 sm:$0xff]  ;;  %v247_v19 = vld [vmem:[%s588_s5 + $0x8] sm:$0xff] }
   0x5   :  { %388 = vmatprep.subr.mxu0 %v443_v3  ;;  %v246_v18 = vld [vmem:[%s588_s5] sm:$0xff] }
   0x6   :  { %437 = vmatpush3.bf16.msra.mxu1 %v431_v11  ;;  %v434_v23 = vpack.c.bf16 %v247_v19, %v246_v18  ;;  %v362_v42 = vld [vmem:[%s590_s6] ss:$0 sm:$0xff] }
   0x7   :  { %433 = vmatprep.subr.bf16.mxu1 %v441_v0 }
   0x8   :  { %389 = vmatpush3.msk.msra.mxu0 %vm53_vm1, %v35_v5 }
   0x9   :  { %391 = vmatmul.mubr.msk.f32.vlgmr.msra.gmra.mrb[0].mxu0 %vm43_vm2, %v30_v6  ;;  %430 = vmatprep.subr.bf16.mxu0 %v441_v0  ;;  %v358_v30 = vld [vmem:[#allocation2] ss:$0 sm:$0xff] }
   0xa   :  { %393 = vmatprep.mubr.msk.f32.mxu0 %vm442_vm0, %v443_v3  ;;  %432 = vmatpush3.bf16.msra.mxu0 %v431_v11 }
   0xd   :  { %394 = vmatmul.mubr.msk.f32.gmra.mrb[2].mxu0 %vm43_vm2, %v31_v7 }
   0xe   :  { %396 = vmatprep.mubr.msk.f32.mxu0 %vm442_vm0, %v443_v3 }
  0x11   :  { %397 = vmatmul.mubr.msk.f32.gmra.mrb[4].mxu0 %vm43_vm2, %v32_v8 }
  0x12   :  { %403 = vmatprep.mubr.msk.f32.mxu0 %vm442_vm0, %v443_v3 }
  0xdc   :  { %v123_v14 = vpop.f32.mrb[0].mxu0 }
  0xdd   :  { %v124_v15 = vadd.f32 %v353_v13, %v123_v14  ;;  %v392_v16 = vpop.f32.mrb[1].mxu0 }
  0xdf   :  { %v137_v17 = vmax.f32 %v124_v15, 0.0 }
  0xe0   :  { %v128_v20 = vpop.f32.mrb[2].mxu0 }
  0xe1   :  { %v129_v21 = vadd.f32 %v353_v13, %v128_v20  ;;  %v395_v22 = vpop.f32.mrb[3].mxu0  ;;  %404 = vmatmul.mubr.msk.f32.vlgmr.msra.gmra.mrb[6].mxu0 %vm149_vm3, %v137_v17 }
  0xe3   :  { %v138_v24 = vmax.f32 %v129_v21, 0.0 }
  0xe4   :  { %v133_v25 = vpop.f32.mrb[4].mxu0 }
  0xe5   :  { %v134_v26 = vadd.f32 %v353_v13, %v133_v25  ;;  %v398_v27 = vpop.f32.mrb[5].mxu0  ;;  %407 = vmatmul.mubr.msk.f32.vlgmr.msra.gmra.mrb[0].mxu1 %vm149_vm3, %v138_v24 }
  0xe6   :  { %435 = vmatpush3.bf16.msra.mxu1 %v434_v23  ;;  %409 = vmatprep.mubr.msk.f32.mxu1 %vm442_vm0, %v443_v3 }
  0xe7   :  { %v139_v28 = vmax.f32 %v134_v26, 0.0  ;;  %416 = vmatprep.subr.mxu1 %v443_v3 }
  0xe9   :  { %410 = vmatmul.mubr.msk.f32.gmra.mrb[2].mxu1 %vm149_vm3, %v139_v28 }
  0xea   :  { %417 = vmatpush3.msk.msra.mxu1 %vm53_vm1, %v248_v29  ;;  %418 = vmatprep.mubr.msk.f32.mxu1 %vm442_vm0, %v443_v3 }
  0xed   :  { %419 = vmatmul.mubr.msk.f32.vlgmr.msra.gmra.mrb[4].mxu1 %vm43_vm2, %v30_v6 }
  0xee   :  { %421 = vmatprep.mubr.msk.f32.mxu1 %vm442_vm0, %v443_v3 }
  0xf1   :  { %422 = vmatmul.mubr.msk.f32.gmra.mrb[6].mxu1 %vm43_vm2, %v31_v7 }
  0xf2   :  { %424 = vmatprep.mubr.msk.f32.mxu1 %vm442_vm0, %v443_v3 }
  0xf5   :  { %425 = vmatmul.mubr.msk.f32.gmra.mrb[8].mxu1 %vm43_vm2, %v32_v8 }
 0x1b4   :  { %v225_v31 = vpop.f32.mrb[6].mxu0 }
 0x1b5   :  { %v226_v32 = vadd.f32 %v358_v30, %v225_v31  ;;  %v405_v33 = vpop.f32.mrb[7].mxu0 }
 0x1b7   :  { %v239_v34 = vmax.f32 %v226_v32, 0.0 }
 0x1b8   :  { %v230_v35 = vpop.f32.mrb[0].mxu1 }
 0x1b9   :  { %243 = vst.msk [vmem:[%s589_s8] sm:$0xff] %vm242_vm4, %v239_v34  ;;  %v231_v36 = vadd.f32 %v358_v30, %v230_v35  ;;  %v408_v37 = vpop.f32.mrb[1].mxu1 }
 0x1bb   :  { %v240_v38 = vmax.f32 %v231_v36, 0.0 }
 0x1bc   :  { %v235_v39 = vpop.f32.mrb[2].mxu1 }
 0x1bd   :  { %244 = vst.msk [vmem:[%s589_s8 + $0x8] sm:$0xff] %vm242_vm4, %v240_v38  ;;  %v236_v40 = vadd.f32 %v358_v30, %v235_v39  ;;  %v411_v41 = vpop.f32.mrb[3].mxu1 }
 0x1bf   :  { %v241_v43 = vmax.f32 %v236_v40, 0.0 }
 0x1c0   :  { %v325_v44 = vpop.f32.mrb[4].mxu1 }
 0x1c1   :  { %245 = vst.msk [vmem:[%s589_s8 + $0x10] sm:$0xff] %vm242_vm4, %v241_v43  ;;  %v326_v45 = vadd.f32 %v362_v42, %v325_v44  ;;  %v420_v46 = vpop.f32.mrb[5].mxu1 }
 0x1c3   :  { %v339_v47 = vadd.f32 %v326_v45, %v137_v17 }
 0x1c4   :  { %v330_v48 = vpop.f32.mrb[6].mxu1 }
 0x1c5   :  { %342 = vst.msk [vmem:[%s591_s7] sm:$0xff] %vm149_vm3, %v339_v47  ;;  %v331_v49 = vadd.f32 %v362_v42, %v330_v48  ;;  %v423_v50 = vpop.f32.mrb[7].mxu1 }
 0x1c7   :  { %v340_v51 = vadd.f32 %v331_v49, %v138_v24 }
 0x1c8   :  { %v335_v52 = vpop.f32.mrb[8].mxu1 }
 0x1c9   :  { %343 = vst.msk [vmem:[%s591_s7 + $0x8] sm:$0xff] %vm149_vm3, %v340_v51  ;;  %v336_v53 = vadd.f32 %v362_v42, %v335_v52  ;;  %v426_v54 = vpop.f32.mrb[9].mxu1 }
 0x1cb   :  { %v341_v55 = vadd.f32 %v336_v53, %v139_v28 }
 0x1cd   :  { %344 = vst.msk [vmem:[%s591_s7 + $0x10] sm:$0xff] %vm149_vm3, %v341_v55 }

// kernel: res_egblk_forward.3
= control target key start
LH: loop header
LB: loop body
LE: loop exit
PB: predicated region body
PF: predicated region fallthrough
CT: control target
= control target key end

     0   :  { %vm43_vm0 = vcmask 64512   ;;  %s561_s0 = inlined_call_operand.vmem [shape: f32[16,16], index: 0, kind: input, shape index: {}]   ;;  %s562_s1 = inlined_call_operand.vmem [shape: f32[16,8], index: 1, kind: input, shape index: {}, may-alias: {1,3}]   ;;  %s563_s2 = inlined_call_operand.vmem [shape: f32[16,1], index: 2, kind: input, shape index: {}, may-alias: {2,4}]   ;;  %s564_s3 = inlined_call_operand.vmem [shape: f32[16,8], index: 3, kind: input, shape index: {}, may-alias: {1,3}]   ;;  %s565_s4 = inlined_call_operand.vmem [shape: f32[16,1], index: 4, kind: input, shape index: {}, may-alias: {2,4}]   ;;  %s566_s5 = inlined_call_operand.vmem [shape: f32[8,16], index: 5, kind: input, shape index: {}]   ;;  %s567_s6 = inlined_call_operand.vmem [shape: f32[1,16], index: 6, kind: input, shape index: {}]   ;;  %s568_s7 = inlined_call_operand.vmem [shape: f32[8,16], index: 7, kind: input, shape index: {}]   ;;  %s569_s8 = inlined_call_operand.vmem [shape: f32[1,16], index: 8, kind: input, shape index: {}]   ;;  %s570_s9 = inlined_call_operand.hbm [shape: f32[16,16], index: 9, kind: output, shape index: {}]  }
   0x1   :  { %v42_v0 = vld [vmem:[%s566_s5] sm:$0xff]  ;;  %v41_v2 = vld [vmem:[%s562_s1 + $0x8] sm:$0xff] }
   0x2   :  { %v40_v1 = vld [vmem:[%s562_s1] sm:$0xff]  ;;  %388 = vmatprep.subr.mxu0 %v42_v0 }
   0x3   :  { %390 = vmatprep.mubr.msk.f32.mxu0 %vm43_vm0, %v40_v1  ;;  %v129_v3 = vld [vmem:[%s563_s2] sm:$0xff] }
   0x4   :  { %14 = vsyncpa [#allocation4], 0  ;;  %389 = vmatpush3.msra.mxu0 %v42_v0  ;;  %v440_v4 = vmov 0   ;;  %v130_v5 = vld [vmem:[%s563_s2 + $0x8] sm:$0xff]  ;;  %vm37_vm1 = vcmask 130048   ;;  %v127_v6 = vld [vmem:[%s561_s0] sm:$0xff] }
   0x5   :  { %414 = vset.pattern.permute.xlu0 %v440_v4  ;;  %391 = vmatmul.mubr.msk.f32.vlgmr.msra.gmra.mrb[0].mxu0 %vm43_vm0, %v41_v2  ;;  %v261_v7 = vld [vmem:[%s568_s7] sm:$0xff]  ;;  %v260_v9 = vld [vmem:[%s564_s3 + $0x8] sm:$0xff]  ;;  %v441_v11 = vmov 0.0   ;;  %s442_s30 = smov [#allocation3]  }
   0x6   :  { %133 = vperm.xlu0 %414, %v129_v3   ;;  %415 = vset.pattern.permute.xlu1 %v440_v4  ;;  %v259_v8 = vld [vmem:[%s564_s3] sm:$0xff]  ;;  %39 = vst.msk [vmem:[#allocation2 + $0x8] sm:$0xff] %vm37_vm1, %v441_v11  ;;  %38 = vst.msk [vmem:[#allocation2] sm:$0xff] %vm37_vm1, %v441_v11  ;;  %v233_v12 = vld [vmem:[%s565_s4 + $0x8] sm:$0xff]  ;;  %s359_s10 = sshll.u32 %s442_s30, 4  ;;  %s360_s10 = int_to_ptr.vmem [resolvable:$true] %s359_s10 }
   0x7   :  { %397 = vmatprep.mubr.msk.f32.mxu1 %vm37_vm1, %v127_v6  ;;  %400 = vmatprep.subr.mxu0 %v261_v7  ;;  %v232_v10 = vld [vmem:[%s565_s4] sm:$0xff]  ;;  %v128_v20 = vld [vmem:[%s561_s0 + $0x8] sm:$0xff]  ;;  %p421_p1 = scmp.lt.s32.totalorder %s360_s10, %s360_s10 }
   0x8   :  { %402 = vmatprep.mubr.msk.f32.mxu0 %vm43_vm0, %v259_v8  ;;  %401 = vmatpush3.msra.mxu0 %v261_v7  ;;  %v374_v30 = vld [vmem:[%s567_s6] ss:$0 sm:$0xff]  ;;  %s416_s6 = scalar_lea.vmem %s360_s10, 256 }
   0x9   :  { %238 = vperm.xlu1 %415, %v232_v10   ;;  %403 = vmatmul.mubr.msk.f32.vlgmr.msra.gmra.mrb[2].mxu0 %vm43_vm0, %v260_v9  ;;  %v375_v33 = vld [vmem:[%s569_s8] ss:$0 sm:$0xff]  ;;  %p417_p0 = scmp.ne.s32.totalorder %s360_s10, %s416_s6  ;;  %p422_p2 = scmp.lt.s32.totalorder %s416_s6, %s416_s6 }
   0xa   :  { %138 = vperm.xlu0 %414, %v130_v5  }
   0xb   :  { %p423_p3 = por %p422_p2, %p421_p1 }
   0xd   :  { %243 = vperm.xlu1 %415, %v233_v12   ;;  %v126_v23 = vld [vmem:[#allocation2 + $0x8] sm:$0xff]  ;;  %v125_v24 = vld [vmem:[#allocation2] sm:$0xff]  ;;  %p424_p4 = pnand %p423_p3, %p417_p0 }
  0x85   :  { %v134_v13 = vpop.permute.xlu0 %133 }
  0x88   :  { %v239_v29 = vpop.permute.xlu1 %238 }
  0x89   :  { %v139_v14 = vpop.permute.xlu0 %138 }
  0x8c   :  { %v244_v31 = vpop.permute.xlu1 %243 }
  0xd8   :  { %v392_v15 = vpop.f32.mrb[0].mxu0 }
  0xd9   :  { %v142_v16 = vmul.f32 %v392_v15, %v139_v14  ;;  %v116_v17 = vpop.f32.mrb[1].mxu0 }
  0xda   :  { %v141_v18 = vmul.f32 %v134_v13, %v116_v17 }
  0xdc   :  { %v405_v19 = vpack.c.bf16 %v142_v16, %v141_v18  ;;  %v404_v21 = vpop.f32.mrb[2].mxu0 }
  0xdd   :  { %v341_v22 = vpop.f32.mrb[3].mxu0  ;;  %v347_v38 = vadd.f32 %v404_v21, %v375_v33 }
  0xde   :  { %406 = vmatprep.subr.bf16.mxu1 %v405_v19  ;;  %v342_v40 = vadd.f32 %v375_v33, %v341_v22 }
  0xdf   :  { %408 = vmatpush3.bf16.msra.mxu1 %v405_v19 }
  0xe2   :  { %398 = vmatmul.mubr.msk.f32.vlgmr.msra.gmra.mrb[0].mxu1 %vm37_vm1, %v128_v20 }
 0x1b5   :  { %v399_v25 = vpop.f32.mrb[0].mxu1 }
 0x1b6   :  { %v226_v26 = vadd.f32 %v399_v25, %v126_v23  ;;  %v216_v27 = vpop.f32.mrb[1].mxu1 }
 0x1b7   :  { %v225_v28 = vadd.f32 %v216_v27, %v125_v24 }
 0x1b8   :  { %228 = vst.msk [vmem:[#allocation2 + $0x8] sm:$0xff] %vm37_vm1, %v226_v26 }
 0x1b9   :  { %227 = vst.msk [vmem:[#allocation2] sm:$0xff] %vm37_vm1, %v225_v28 }
 0x1bf   :  { %v235_v32 = vld [vmem:[#allocation2 + $0x8] sm:$0xff] }
 0x1c0   :  { %v234_v34 = vld [vmem:[#allocation2] sm:$0xff]  ;;  %v247_v35 = vmul.f32 %v244_v31, %v235_v32 }
 0x1c1   :  { %v246_v36 = vmul.f32 %v239_v29, %v234_v34 }
 0x1c2   :  { %v256_v37 = vadd.f32 %v374_v30, %v247_v35 }
 0x1c3   :  { %v255_v39 = vadd.f32 %v374_v30, %v246_v36 }
 0x1c4   :  { %v258_v41 = vmax.f32 %v256_v37, 0.0 }
 0x1c5   :  { %v257_v42 = vmax.f32 %v255_v39, 0.0 }
 0x1c6   :  { %v351_v43 = vadd.f32 %v347_v38, %v258_v41 }
 0x1c7   :  { %v350_v44 = vadd.f32 %v342_v40, %v257_v42 }
 0x1c8   :  { %353 = vst.msk [vmem:[#allocation3 + $0x8] sm:$0xff] %vm37_vm1, %v351_v43 }
 0x1c9   :  { %352 = vst.msk [vmem:[#allocation3] sm:$0xff] %vm37_vm1, %v350_v44 }
 0x1ca   :  { %427 = shalt.err (!%p424_p4)
}
 0x1cb   :  { %s428_s12 = scalar_lea.hbm %s570_s9, 256 }
 0x1cc   :  { %p429_p5 = scmp.ne.s32.totalorder %s570_s9, %s428_s12  ;;  %p432_p6 = scmp.lt.u32.totalorder %s428_s12, %s570_s9 }
 0x1ce   :  { %p434_p7 = pnand %p432_p6, %p429_p5 }
 0x1d0   :  { %437 = shalt.err (!%p434_p7)
}
 0x1d1   :  { %s443_s5 = smov 128   ;;  %s444_s17 = smov 8  }
 0x1d2   :  { %365 = dma.vmem_to_hbm [thread:$0]  %s360_s10, 256, %s570_s9, [#allocation4], %s443_s5, %s443_s5, %s444_s17  }
 0x1d3   :  { %438 = dma.done.wait [#allocation4], 256  }
 0x1d4   :  { %439 = vsyncadd [#allocation4], 4294967040 }
 0x1d5   :  { %369 = vsyncpa [#allocation4], 1 }

</bundles_post_ra>
